<compile_context>
chip_gen: v5e
topology: v5e:2x2
jax: 0.10.0
libtpu: 0.0.40
codegen_flags: <defaults>
</compile_context>

<pallas_src>
import jax
import jax.numpy as jnp
from jax.experimental import pallas as pl
from jax.experimental.pallas import tpu as pltpu

INPUT_DIM = 4
HIDDEN_DIM = 16
OUTPUT_DIM = 1
_LANES = 128


def _cdiv(a, b):
    return -(-a // b)


def _mlp_kernel(xt_ref, w1_ref, b1_ref, w2_ref, b2_ref, w3_ref, b3_ref, o_ref):
    # Feature-major throughout: batch sits on the lane (minor) axis.
    xt = xt_ref[...]                                                    # (4, tb) bf16

    # Layer 1: (16, tb) = W1(16,4) @ x^T(4,tb); bf16 MXU operands, f32 accumulation.
    h1 = jnp.dot(w1_ref[...], xt, preferred_element_type=jnp.float32)
    h1 = jnp.maximum(h1 + b1_ref[...], 0.0)                            # bias (16,1) f32

    # Layer 2: (16, tb) = W2(16,16) @ h1(16,tb); bf16 operands, f32 accumulation.
    h2 = jnp.dot(w2_ref[...], h1.astype(jnp.bfloat16),
                 preferred_element_type=jnp.float32)
    h2 = jnp.maximum(h2 + b2_ref[...], 0.0)

    # Layer 3 (single output feature): VPU multiply + sublane (XLU) reduction instead
    # of an M=1 MXU matmul; scalar bias comes from SMEM.
    logits = jnp.sum(h2 * w3_ref[...], axis=0, keepdims=True) + b3_ref[0, 0]  # (1, tb)

    o_ref[...] = jax.nn.sigmoid(logits).astype(o_ref.dtype)            # lane-dense store


def _choose_batch_tile(batch, max_tile):
    """Lane-aligned batch tile, as large as allowed; keep >= 2 roughly balanced grid
    steps when the batch permits so both v7x TensorCores get work (no-op on v5e/v6e)."""
    max_tile = max(_LANES, (max_tile // _LANES) * _LANES)
    b_up = _cdiv(batch, _LANES) * _LANES
    tile = min(max_tile, b_up)
    if b_up > _LANES and _cdiv(batch, tile) < 2:
        tile = _cdiv(b_up // 2, _LANES) * _LANES
    return tile


def risk_prediction_mlp(x, params, *, batch_tile=16384,
                        feature_major_input=False, lane_major_output=False):
    """Fused MLP forward.

    x: (B, INPUT_DIM) float32, or — with feature_major_input=True — an (INPUT_DIM, B)
       slab (bf16 or f32), which skips the wrapper-side transpose/cast HBM pass.
    Returns (B, OUTPUT_DIM) float32; with lane_major_output=True returns the raw
    lane-dense (1, B) kernel output (skips the (1,B)->(B,1) relayout pass).
    """
    w1, b1, w2, b2, w3, b3 = params

    if feature_major_input:
        in_dim, B = x.shape
        xt = x.astype(jnp.bfloat16)
    else:
        B, in_dim = x.shape
        # allow_input_fusion below lets XLA pull this transpose+convert into the
        # pallas_call operand instead of running it as a separate HBM pass.
        xt = x.T.astype(jnp.bfloat16)
    assert in_dim == INPUT_DIM
    assert OUTPUT_DIM == 1

    tb = _choose_batch_tile(B, batch_tile)
    num_tiles = _cdiv(B, tb)            # ragged tail handled by Pallas partial blocks

    w1b = w1.astype(jnp.bfloat16)                           # (16, 4)   MXU operand
    w2b = w2.astype(jnp.bfloat16)                           # (16, 16)  MXU operand
    b1c = b1.reshape(HIDDEN_DIM, 1).astype(jnp.float32)     # feature-major bias columns
    b2c = b2.reshape(HIDDEN_DIM, 1).astype(jnp.float32)
    w3c = w3.reshape(HIDDEN_DIM, 1).astype(jnp.float32)     # head weights, used on VPU
    b3s = b3.reshape(1, 1).astype(jnp.float32)              # scalar bias -> SMEM

    # ~200 B of VMEM per lane (double-buffered I/O + f32 h1/h2): only very large tiles
    # need the scoped-VMEM cap raised (v5e default is 16 MiB).
    vmem_limit = None
    est_vmem = tb * 200
    if est_vmem > (12 << 20):
        vmem_limit = min(2 * est_vmem, 100 << 20)

    out = pl.pallas_call(
        _mlp_kernel,
        out_shape=jax.ShapeDtypeStruct((1, B), jnp.float32),
        grid=(num_tiles,),
        in_specs=[
            pl.BlockSpec((INPUT_DIM, tb), lambda i: (0, i)),           # x^T batch tile
            pl.BlockSpec((HIDDEN_DIM, INPUT_DIM), lambda i: (0, 0)),   # W1
            pl.BlockSpec((HIDDEN_DIM, 1), lambda i: (0, 0)),           # b1
            pl.BlockSpec((HIDDEN_DIM, HIDDEN_DIM), lambda i: (0, 0)),  # W2
            pl.BlockSpec((HIDDEN_DIM, 1), lambda i: (0, 0)),           # b2
            pl.BlockSpec((HIDDEN_DIM, 1), lambda i: (0, 0)),           # w3 column
            pl.BlockSpec(memory_space=pltpu.MemorySpace.SMEM),         # b3 scalar
        ],
        out_specs=pl.BlockSpec((1, tb), lambda i: (0, i)),             # lane-dense out
        compiler_params=pltpu.CompilerParams(
            dimension_semantics=("parallel",),
            allow_input_fusion=[True] + [False] * 6,
            vmem_limit_bytes=vmem_limit,
        ),
    )(xt, w1b, b1c, w2b, b2c, w3c, b3s)

    if lane_major_output:
        return out                       # (1, B) lane-dense; no relayout pass
    return out.reshape(B, OUTPUT_DIM)    # PyTorch (B, 1) layout


def init_params(key):
    """PyTorch nn.Linear-style init: U(-1/sqrt(fan_in), 1/sqrt(fan_in)); weight (out, in)."""
    def linear(k, fan_in, fan_out):
        kw, kb = jax.random.split(k)
        bound = 1.0 / jnp.sqrt(jnp.float32(fan_in))
        w = jax.random.uniform(kw, (fan_out, fan_in), jnp.float32, -bound, bound)
        b = jax.random.uniform(kb, (fan_out,), jnp.float32, -bound, bound)
        return w, b

    k1, k2, k3 = jax.random.split(key, 3)
    w1, b1 = linear(k1, INPUT_DIM, HIDDEN_DIM)
    w2, b2 = linear(k2, HIDDEN_DIM, HIDDEN_DIM)
    w3, b3 = linear(k3, HIDDEN_DIM, OUTPUT_DIM)
    return (w1, b1, w2, b2, w3, b3)


def _reference(x, params):
    """Pure-JAX f32 reference matching the PyTorch module."""
    w1, b1, w2, b2, w3, b3 = params
    hp = jax.lax.Precision.HIGHEST
    h1 = jnp.maximum(jnp.dot(x, w1.T, precision=hp) + b1, 0.0)
    h2 = jnp.maximum(jnp.dot(h1, w2.T, precision=hp) + b2, 0.0)
    return jax.nn.sigmoid(jnp.dot(h2, w3.T, precision=hp) + b3)


if __name__ == "__main__":
    key = jax.random.PRNGKey(0)
    kp, kx = jax.random.split(key)

    params = init_params(kp)
    B = 300                      # not a lane multiple: exercises the masked tail block
    x = jax.random.normal(kx, (B, INPUT_DIM), jnp.float32)

    # jit the wrapper so the x transpose/cast can fuse into the pallas_call operand.
    fwd = jax.jit(lambda xi: risk_prediction_mlp(xi, params))
    out = jax.block_until_ready(fwd(x))    # tile chooser -> tb=256, grid=(2,)

    ref = _reference(x, params)
    assert out.shape == (B, OUTPUT_DIM)
    max_err = float(jnp.max(jnp.abs(out - ref)))
    # bf16 matmul operands (and bf16 input) vs a true-f32 reference: tolerance ~1e-2.
    assert jnp.allclose(out, ref, atol=2e-2, rtol=1e-2), max_err

    print("KERNEL_OK")
</pallas_src>

<mosaic_0001>
module attributes {stable_mosaic.version = 11 : i64} {
  func.func @_mlp_kernel(%arg0: i32, %arg1: memref<4x256xbf16, #tpu.memory_space<vmem>>, %arg2: memref<16x4xbf16, #tpu.memory_space<vmem>>, %arg3: memref<16x1xf32, #tpu.memory_space<vmem>>, %arg4: memref<16x16xbf16, #tpu.memory_space<vmem>>, %arg5: memref<16x1xf32, #tpu.memory_space<vmem>>, %arg6: memref<16x1xf32, #tpu.memory_space<vmem>>, %arg7: memref<1x1xf32, #tpu.memory_space<smem>>, %arg8: memref<1x256xf32, #tpu.memory_space<vmem>>) attributes {dimension_semantics = [#tpu.dimension_semantics<parallel>], iteration_bounds = array<i64: 2>, scalar_prefetch = 0 : i64, scratch_operands = 0 : i64, tpu.core_type = #tpu.core_type<tc>, window_params = [{transform_indices = @transform_0, window_bounds = array<i64: 4, 256>}, {pipeline_mode = #tpu.pipeline_mode<synchronous>, transform_indices = @transform_1, window_bounds = array<i64: 16, 4>}, {pipeline_mode = #tpu.pipeline_mode<synchronous>, transform_indices = @transform_2, window_bounds = array<i64: 16, 1>}, {pipeline_mode = #tpu.pipeline_mode<synchronous>, transform_indices = @transform_3, window_bounds = array<i64: 16, 16>}, {pipeline_mode = #tpu.pipeline_mode<synchronous>, transform_indices = @transform_4, window_bounds = array<i64: 16, 1>}, {pipeline_mode = #tpu.pipeline_mode<synchronous>, transform_indices = @transform_5, window_bounds = array<i64: 16, 1>}, {transform_indices = @transform_6, window_bounds = array<i64: 1, 1>}, {transform_indices = @transform_7, window_bounds = array<i64: 1, 256>}]} {
    %c0 = arith.constant 0 : index
    %c0_0 = arith.constant 0 : index
    %0 = vector.load %arg1[%c0, %c0_0] : memref<4x256xbf16, #tpu.memory_space<vmem>>, vector<4x256xbf16>
    %c0_1 = arith.constant 0 : index
    %c0_2 = arith.constant 0 : index
    %1 = vector.load %arg2[%c0_1, %c0_2] : memref<16x4xbf16, #tpu.memory_space<vmem>>, vector<16x4xbf16>
    %cst = arith.constant dense<0.000000e+00> : vector<16x256xf32>
    %2 = tpu.matmul %1, %0, %cst {dimension_numbers = #tpu.dot_dimension_numbers<[1], [0], [0], [1], [0, 0, 1, 1], [], []>} : vector<16x4xbf16>, vector<4x256xbf16>, vector<16x256xf32> -> vector<16x256xf32>
    %c0_3 = arith.constant 0 : index
    %c0_4 = arith.constant 0 : index
    %3 = vector.load %arg3[%c0_3, %c0_4] : memref<16x1xf32, #tpu.memory_space<vmem>>, vector<16x1xf32>
    %4 = vector.broadcast %3 : vector<16x1xf32> to vector<16x256xf32>
    %5 = arith.addf %2, %4 : vector<16x256xf32>
    %cst_5 = arith.constant 0.000000e+00 : f32
    %6 = vector.broadcast %cst_5 : f32 to vector<16x256xf32>
    %7 = arith.maximumf %5, %6 : vector<16x256xf32>
    %c0_6 = arith.constant 0 : index
    %c0_7 = arith.constant 0 : index
    %8 = vector.load %arg4[%c0_6, %c0_7] : memref<16x16xbf16, #tpu.memory_space<vmem>>, vector<16x16xbf16>
    %9 = arith.truncf %7 : vector<16x256xf32> to vector<16x256xbf16>
    %cst_8 = arith.constant dense<0.000000e+00> : vector<16x256xf32>
    %10 = tpu.matmul %8, %9, %cst_8 {dimension_numbers = #tpu.dot_dimension_numbers<[1], [0], [0], [1], [0, 0, 1, 1], [], []>} : vector<16x16xbf16>, vector<16x256xbf16>, vector<16x256xf32> -> vector<16x256xf32>
    %c0_9 = arith.constant 0 : index
    %c0_10 = arith.constant 0 : index
    %11 = vector.load %arg5[%c0_9, %c0_10] : memref<16x1xf32, #tpu.memory_space<vmem>>, vector<16x1xf32>
    %12 = vector.broadcast %11 : vector<16x1xf32> to vector<16x256xf32>
    %13 = arith.addf %10, %12 : vector<16x256xf32>
    %cst_11 = arith.constant 0.000000e+00 : f32
    %14 = vector.broadcast %cst_11 : f32 to vector<16x256xf32>
    %15 = arith.maximumf %13, %14 : vector<16x256xf32>
    %c0_12 = arith.constant 0 : index
    %c0_13 = arith.constant 0 : index
    %16 = vector.load %arg6[%c0_12, %c0_13] : memref<16x1xf32, #tpu.memory_space<vmem>>, vector<16x1xf32>
    %17 = vector.broadcast %16 : vector<16x1xf32> to vector<16x256xf32>
    %18 = arith.mulf %15, %17 : vector<16x256xf32>
    %cst_14 = arith.constant dense<0.000000e+00> : vector<256xf32>
    %19 = vector.multi_reduction <add>, %18, %cst_14 [0] : vector<16x256xf32> to vector<256xf32>
    %20 = vector.shape_cast %19 : vector<256xf32> to vector<1x256xf32>
    %c0_15 = arith.constant 0 : index
    %c0_16 = arith.constant 0 : index
    %21 = memref.load %arg7[%c0_15, %c0_16] : memref<1x1xf32, #tpu.memory_space<smem>>
    %22 = vector.broadcast %21 : f32 to vector<1x256xf32>
    %23 = arith.addf %20, %22 : vector<1x256xf32>
    %24 = arith.negf %23 : vector<1x256xf32>
    %25 = math.exp %24 : vector<1x256xf32>
    %cst_17 = arith.constant 1.000000e+00 : f32
    %26 = vector.broadcast %cst_17 : f32 to vector<1x256xf32>
    %27 = arith.addf %26, %25 : vector<1x256xf32>
    %28 = arith.divf %26, %27 : vector<1x256xf32>
    %c0_18 = arith.constant 0 : index
    %c0_19 = arith.constant 0 : index
    %29 = vector.load %arg8[%c0_18, %c0_19] : memref<1x256xf32, #tpu.memory_space<vmem>>, vector<1x256xf32>
    tpu.vector_store %arg8[%c0_18, %c0_19], %28 {strides = array<i32>} : memref<1x256xf32, #tpu.memory_space<vmem>>, vector<1x256xf32>,
    return
  }
  func.func @transform_0(%arg0: i32) -> (i32, i32) {
    %c0_i32 = arith.constant 0 : i32
    %c0_i32_0 = arith.constant 0 : i32
    return %c0_i32, %arg0 : i32, i32
  }
  func.func @transform_1(%arg0: i32) -> (i32, i32) {
    %c0_i32 = arith.constant 0 : i32
    %c0_i32_0 = arith.constant 0 : i32
    %c0_i32_1 = arith.constant 0 : i32
    return %c0_i32, %c0_i32_0 : i32, i32
  }
  func.func @transform_2(%arg0: i32) -> (i32, i32) {
    %c0_i32 = arith.constant 0 : i32
    %c0_i32_0 = arith.constant 0 : i32
    %c0_i32_1 = arith.constant 0 : i32
    return %c0_i32, %c0_i32_0 : i32, i32
  }
  func.func @transform_3(%arg0: i32) -> (i32, i32) {
    %c0_i32 = arith.constant 0 : i32
    %c0_i32_0 = arith.constant 0 : i32
    %c0_i32_1 = arith.constant 0 : i32
    return %c0_i32, %c0_i32_0 : i32, i32
  }
  func.func @transform_4(%arg0: i32) -> (i32, i32) {
    %c0_i32 = arith.constant 0 : i32
    %c0_i32_0 = arith.constant 0 : i32
    %c0_i32_1 = arith.constant 0 : i32
    return %c0_i32, %c0_i32_0 : i32, i32
  }
  func.func @transform_5(%arg0: i32) -> (i32, i32) {
    %c0_i32 = arith.constant 0 : i32
    %c0_i32_0 = arith.constant 0 : i32
    %c0_i32_1 = arith.constant 0 : i32
    return %c0_i32, %c0_i32_0 : i32, i32
  }
  func.func @transform_6(%arg0: i32) -> (i32, i32) {
    %c0_i32 = arith.constant 0 : i32
    %c0_i32_0 = arith.constant 0 : i32
    %c0_i32_1 = arith.constant 0 : i32
    return %c0_i32, %c0_i32_0 : i32, i32
  }
  func.func @transform_7(%arg0: i32) -> (i32, i32) {
    %c0_i32 = arith.constant 0 : i32
    %c0_i32_0 = arith.constant 0 : i32
    return %c0_i32, %arg0 : i32, i32
  }
}

</mosaic_0001>

<bundles_post_ra>
// kernel: _lambda_.2
= control target key start
LH: loop header
LB: loop body
LE: loop exit
PB: predicated region body
PF: predicated region fallthrough
CT: control target
= control target key end

     0   :  { %s1470_s0 = inlined_call_operand.hbm [shape: bf16[16,4], index: 0, kind: input, shape index: {}]   ;;  %s1471_s1 = inlined_call_operand.hbm [shape: f32[16,1], index: 1, kind: input, shape index: {}]   ;;  %s1472_s2 = inlined_call_operand.hbm [shape: bf16[16,16], index: 2, kind: input, shape index: {}]   ;;  %s1473_s3 = inlined_call_operand.hbm [shape: f32[16,1], index: 3, kind: input, shape index: {}]   ;;  %s1474_s4 = inlined_call_operand.hbm [shape: f32[16,1], index: 4, kind: input, shape index: {}]   ;;  %s1475_s5 = inlined_call_operand.<no memory space> [shape: f32[1,1], index: 5, kind: input, shape index: {}]   ;;  %s1476_s6 = inlined_call_operand.hbm [shape: f32[300,4], index: 6, kind: input, shape index: {}]   ;;  %s1477_s7 = inlined_call_operand.hbm [shape: f32[1,300], index: 7, kind: output, shape index: {}]  }
   0x1   :  { %1482 = sst [smem:[#allocation23_spill]] %s1470_s0 }
   0x2   :  { %1483 = sst [smem:[#allocation24_spill]] %s1471_s1 }
   0x3   :  { %1484 = sst [smem:[#allocation25_spill]] %s1472_s2 }
   0x4   :  { %12 = sst [smem:[#allocation2]] %s1475_s5 }
   0x5   :  { %13 = vsyncpa [#allocation4], 0 }
   0x6   :  { %15 = vsyncpa [#allocation4 + $0x1], 0 }
   0x7   :  { %16 = vsyncpa [#allocation7], 0 }
   0x8   :  { %17 = vsyncpa [#allocation10], 0 }
   0x9   :  { %18 = vsyncpa [#allocation13], 0 }
   0xa   :  { %19 = vsyncpa [#allocation5], 0 }
   0xb   :  { %21 = vsyncpa [#allocation5 + $0x1], 0  ;;  %s1247_s26 = smov 0   ;;  %s1249_s27 = smov 0  }
   0xc   :  { %s1251_s28 = smov 0   ;;  %s1253_s29 = smov 0  }
   0xd LB: > { %s1268_s5 = sadd.s32 4294967295, %s1190_s29   ;;  %s760_s30 = sadd.s32 4294967294, %s1190_s29   ;;  %s1190_s29 = sphi %s1253_s29, %s1507_s29   ;;  %s1186_s28 = sphi %s1251_s28, %s1511_s28   ;;  %s1182_s27 = sphi %s1249_s27, %s1510_s27   ;;  %s1178_s26 = sphi %s1247_s26, %s1509_s26  }
   0xe   : > { %s1272_s8 = sadd.s32 1, %s1190_s29   ;;  %s34_s9 = sadd.s32 1, %s1186_s28 }
   0xf   : > { %1485 = sst [smem:[#allocation21_spill]] %s1272_s8  ;;  %s31_s10 = ssub.s32 %s1190_s29, %s1272_s8 }
  0x10   : > { %p41_p0 = scmp.ne.s32.totalorder %s1186_s28, %s1182_s27  ;;  %p32_p1 = scmp.eq.s32.totalorder %s31_s10, 0 }
  0x11   : > { %p42_p2 = scmp.eq.s32.totalorder %s1190_s29, 0  ;;  %p47_p3 = scmp.ne.s32.totalorder %s1182_s27, %s1178_s26 }
  0x12   : > { %p1481_p4 = scmp.eq.s32.totalorder %s1268_s5, 0  ;;  %p197_p7 = scmp.eq.s32.totalorder %s1268_s5, 1 }
  0x13   : > { %s1284_s11 = scalar_select %p32_p1, %s1186_s28, %s34_s9  }
  0x14   : > { %p1286_p5 = por %p42_p2, %p41_p0  ;;  %p1292_p6 = por %p1481_p4, %p47_p3 }
  0x15   : > { %1486 = sst [smem:[#allocation22_spill]] %s1284_s11  ;;  %p203_p8 = scmp.eq.s32.totalorder %s760_s30, 1 }
  0x16   : > { %p761_p9 = scmp.ge.s32.totalorder %s1190_s29, 1  ;;  %p210_p10 = scmp.lt.s32.totalorder %s1190_s29, 3 }
  0x17   : > { %p1299_p11 = por %p197_p7, %p41_p0  ;;  %p1303_p12 = por %p203_p8, %p47_p3 }
  0x18   : > { %p1307_p13 = pnand %p761_p9, %p210_p10  ;;  %s1492_s0 = sld [smem:[#allocation23_spill]] }
  0x19   : > { %s1490_s15 = scalar_select %p1303_p12, 1, 0 }
  0x1a   : > { %p828_p1 = pneg %p1307_p13  ;;  %s1192_s20 = smov [#allocation6]  }
  0x1b   : > { %s223_s21 = sshll.u32 %s1192_s20, 4  ;;  %s1494_s2 = sld [smem:[#allocation25_spill]]  ;;  %s224_s21 = int_to_ptr.vmem [resolvable:$true] %s223_s21 }
  0x1c   : > { %p1318_p0 = pnand %p828_p1, %p1481_p4  ;;  %s1193_s30 = smov 64  }
  0x1d   : > { %s1194_s9 = smov 4   ;;  %s1495_s1 = sld [smem:[#allocation24_spill]] }
  0x1e   : > { %s221_s19 = sshll.u32 %s1492_s0, 4  ;;  %s1195_s20 = smov [#allocation9]   ;;  %s222_s19 = int_to_ptr.hbm [resolvable:$true] %s221_s19 }
  0x1f   : > { %831 = dma.hbm_to_vmem [thread:$0]  (!%p1318_p0), %s222_s19, 128, %s224_s21, [#allocation7], %s1193_s30, %s1193_s30, %s1194_s9  }
  0x20   : > { %s251_s0 = sshll.u32 %s1195_s20, 4  ;;  %s1196_s23 = smov [#allocation8]   ;;  %s252_s0 = int_to_ptr.vmem [resolvable:$true] %s251_s0 }
  0x21   : > { %s249_s25 = sshll.u32 %s1494_s2, 4  ;;  %s237_s24 = sshll.u32 %s1196_s23, 4  ;;  %s250_s25 = int_to_ptr.hbm [resolvable:$true] %s249_s25  ;;  %s238_s24 = int_to_ptr.vmem [resolvable:$true] %s237_s24 }
  0x22   : > { %837 = dma.hbm_to_vmem [thread:$0]  (!%p1318_p0), %s250_s25, 128, %s252_s0, [#allocation10], %s1193_s30, %s1193_s30, %s1194_s9  }
  0x23   : > { %s235_s18 = sshll.u32 %s1495_s1, 4  ;;  %s1197_s2 = smov 128   ;;  %s236_s18 = int_to_ptr.hbm [resolvable:$true] %s235_s18 }
  0x24   : > { %s1198_s11 = smov 8   ;;  %s263_s10 = sshll.u32 %s1473_s3, 4  ;;  %s264_s10 = int_to_ptr.hbm [resolvable:$true] %s263_s10 }
  0x25   : > { %834 = dma.hbm_to_vmem [thread:$0]  (!%p1318_p0), %s236_s18, 256, %s238_s24, [#allocation7], %s1197_s2, %s1197_s2, %s1198_s11  }
  0x26   : > { %s1199_s17 = smov [#allocation11]   ;;  %s277_s0 = sshll.u32 %s1474_s4, 4  ;;  %s278_s0 = int_to_ptr.hbm [resolvable:$true] %s277_s0 }
  0x27   : > { %s265_s20 = sshll.u32 %s1199_s17, 4  ;;  %s1200_s25 = smov [#allocation12]   ;;  %s266_s20 = int_to_ptr.vmem [resolvable:$true] %s265_s20 }
  0x28   : > { %840 = dma.hbm_to_vmem [thread:$0]  (!%p1318_p0), %s264_s10, 256, %s266_s20, [#allocation10], %s1197_s2, %s1197_s2, %s1198_s11  }
  0x29   : > { %s279_s30 = sshll.u32 %s1200_s25, 4  ;;  %p1480_p2 = scmp.ge.s32.totalorder %s1190_s29, 2  ;;  %s280_s30 = int_to_ptr.vmem [resolvable:$true] %s279_s30 }
  0x2a   : > { %843 = dma.hbm_to_vmem [thread:$0]  (!%p1318_p0), %s278_s0, 256, %s280_s30, [#allocation13], %s1197_s2, %s1197_s2, %s1198_s11  }
  0x2b   : > { %292 = sbr.rel (%p1480_p2) target bundleno = 83 (0x53), region = 40 }
  0x30   : > { %295 = sbr.rel (!%p1286_p5) target bundleno = 83 (0x53), region = 44  ;;  %s296_s1 = sand.u32 (%p1286_p5), 1, %s1186_s28  }
  0x31   : > { %s769_s8 = sshll.u32 (%p1286_p5), %s1190_s29, 1  ;;  %s768_s9 = sshll.u32 (%p1286_p5), %s296_s1, 3 }
  0x32   : > { %s302_s18 = ssub.s32 (%p1286_p5), 3, %s769_s8  ;;  %s1354_s23 = scalar_lea.sflag (%p1286_p5), [#allocation4], %s296_s1 }
  0x33   : > { %p303_p3 = scmp.lt.s32.totalorder (%p1286_p5), %s302_s18, 2  ;;  %s300_s24 = scalar_lea.vmem (%p1286_p5), [#allocation3], %s768_s9 }
  0x35   : > { %s1513_s18 = smov (!%p303_p3, %s302_s18), 2 }
  0x36   : > { %s770_s22 = sshll.u32 %s1513_s18, 2 }
  0x37   : > { %s306_s2 = ssub.s32 8, %s770_s22 }
  0x38   : > { %s307_s11 = sshll.u32 %s306_s2, 4 }
  0x39   : > { %308 = vsyncadd %s1354_s23, %s307_s11  ;;  %p1357_p5 = scmp.ne.s32.totalorder %s770_s22, 0  ;;  %s803_s19 = sshll.u32 %s1190_s29, 3 }
  0x3a   : > { %s311_s17 = scalar_lea.hbm %s1476_s6, %s803_s19  ;;  %s774_s20 = sshll.u32 %s1513_s18, 6 }
  0x3b   : > { %s314_s0 = sshll.u32 %s311_s17, 4  ;;  %s1366_s25 = sshll.u32 %s300_s24, 4  ;;  %s315_s0 = int_to_ptr.hbm [resolvable:$true] %s314_s0  ;;  %s317_s25 = int_to_ptr.vmem [resolvable:$true] %s1366_s25 }
  0x3c   : > { %s1062_s30 = sshra.s32 %s315_s0, 4  ;;  %s1064_s1 = sshrl.u32 %s774_s20, 4  ;;  %s1063_s30 = int_to_ptr.hbm [resolvable:$true] %s1062_s30 }
  0x3d   : > { %s1069_s8 = scalar_lea.hbm %s1063_s30, %s1064_s1  ;;  %s1073_s2 = scalar_lea.hbm %s1476_s6, 12 }
  0x3e   : > { %p1070_p7 = scmp.ne.s32.totalorder %s1063_s30, %s1069_s8  ;;  %p1074_p10 = scmp.lt.s32.totalorder %s1063_s30, %s1476_s6 }
  0x3f   : > { %p1075_p1 = scmp.lt.s32.totalorder %s1073_s2, %s1069_s8 }
  0x40   : > { %p1071_p8 = pnand %p1070_p7, %p1357_p5 }
  0x41   : > { %p1076_p0 = por %p1075_p1, %p1074_p10 }
  0x42   : > { %p1072_p9 = pneg %p1071_p8 }
  0x44   : > { %p1077_p3 = pnand %p1076_p0, %p1072_p9 }
  0x46   : > { %1080 = shalt.err (!%p1077_p3)
}
  0x47   : > { %s1081_s24 = sshra.s32 %s317_s25, 4  ;;  %s1201_s10 = smov [#allocation3]   ;;  %s1082_s24 = int_to_ptr.vmem [resolvable:$true] %s1081_s24 }
  0x48   : > { %s1088_s21 = scalar_lea.vmem %s1082_s24, %s1064_s1  ;;  %s1092_s17 = scalar_lea.vmem %s1201_s10, 16 }
  0x49   : > { %p1089_p2 = scmp.ne.s32.totalorder %s1082_s24, %s1088_s21  ;;  %p1094_p4 = scmp.lt.s32.totalorder %s1092_s17, %s1088_s21 }
  0x4b   : > { %p1090_p7 = pnand %p1089_p2, %p1357_p5 }
  0x4d   : > { %p1091_p8 = pneg %p1090_p7 }
  0x4f   : > { %p1096_p12 = pnand %p1094_p4, %p1091_p8 }
  0x51   : > { %1099 = shalt.err (!%p1096_p12)
}
  0x52   : > { %319 = dma.hbm_to_vmem [thread:$0]  (%p1357_p5), %s315_s0, %s774_s20, %s317_s25, %s1354_s23  }
  0x53 PF: > { %325 = sbr.rel (%p1307_p13) target bundleno = 493 (0x1ed), region = 48 }
  0x58   : > { %s1389_s30 = sand.u32 1, %s1182_s27  }
  0x59   : > { %s776_s1 = sshll.u32 %s1389_s30, 3  ;;  %s328_s8 = scalar_lea.sflag [#allocation4], %s1389_s30 }
  0x5a   : > { %s331_s9 = scalar_lea.vmem [#allocation3], %s776_s1 }
  0x5b   : > { %1157 = dma.done.wait (%p1292_p6), %s328_s8, 128  }
  0x5c   : > { %1159 = vsyncadd (%p1292_p6), %s328_s8, 4294967168  ;;  %p1497_p4 = scmp.eq.s32.totalorder %s1268_s5, 0 }
  0x5e   : > { %1161 = dma.done.wait (%p1497_p4), [#allocation7], 384   ;;  %p1498_p12 = pmov %p1497_p4 }
  0x5f   : > { %p1499_p13 = pmov %p1497_p4 }
  0x60   : > { %1163 = vsyncadd (%p1498_p12), [#allocation7], 4294966912 }
  0x61   : > { %1165 = dma.done.wait (%p1499_p13), [#allocation10], 384   ;;  %p1500_p2 = pmov %p1497_p4 }
  0x63   : > { %1167 = vsyncadd (%p1500_p2), [#allocation10], 4294966912  ;;  %p1501_p5 = pmov %p1500_p2 }
  0x64   : > { %p1502_p9 = pmov %p1500_p2 }
  0x65   : > { %1169 = dma.done.wait (%p1501_p5), [#allocation13], 256  }
  0x66   : > { %1171 = vsyncadd (%p1502_p9), [#allocation13], 4294967040  ;;  %v1202_v0 = vmov 0   ;;  %v397_v1 = vld [vmem:[%s331_s9] sm:$0xf]  ;;  %v419_v5 = vld [vmem:[#allocation8] sm:$0xff] }
  0x67   : > { %901 = vset.pattern.permute.xlu0 %v1202_v0  ;;  %902 = vset.pattern.permute.xlu1 %v1202_v0  ;;  %v783_v2 = vld [vmem:[%s331_s9 + $0x4] sm:$0xf]  ;;  %v401_v3 = vpack.c.bf16 0.0, %v397_v1  ;;  %vm444_vm0 = vcmask 1041408   ;;  %v804_v12 = vld [vmem:[#allocation6] sm:$0xff]  ;;  %vm440_vm1 = vcmask 31744  }
  0x68   : > { %903 = vset.pattern.permute.xlu2 %v1202_v0  ;;  %v411_v4 = vpack.c.bf16 0.0, %v783_v2  ;;  %423 = vperm.xlu0 %901, %v419_v5   ;;  %v420_v6 = vld [vmem:[#allocation8 + $0x8] sm:$0xff]  ;;  %v485_v13 = vld [vmem:[#allocation11] sm:$0xff]  ;;  %v486_v15 = vld [vmem:[#allocation11 + $0x8] sm:$0xff]  ;;  %vm502_vm2 = vcmask 130048   ;;  %s568_s13 = sld [smem:[#allocation2]] }
  0x69   : > { %404 = vst [vmem:[#allocation15] sm:$0x3] %v401_v3  ;;  %v538_v14 = vld [vmem:[#allocation12] sm:$0xff]  ;;  %489 = vperm.xlu1 %902, %v485_v13   ;;  %v539_v16 = vld [vmem:[#allocation12 + $0x8] sm:$0xff]  ;;  %s782_s16 = sshll.u32 %s1389_s30, 1  ;;  %vm613_vm10 = vcmask 1040384  }
  0x6a   : > { %414 = vst [vmem:[#allocation15 + $0x2] sm:$0x3] %v411_v4  ;;  %542 = vperm.xlu2 %903, %v538_v14   ;;  %v805_v33 = vld [vmem:[#allocation9] sm:$0xff]  ;;  %s387_s18 = scalar_lea.vmem [#allocation14], %s782_s16  ;;  %s622_s23 = scalar_lea.sflag [#allocation5], %s1389_s30 }
  0x6b   : > { %s799_s12 = sshll.u32 (%p1299_p11), %s1268_s5, 1 }
  0x6c   : > { %s630_s20 = ssub.s32 (%p1299_p11), 3, %s799_s12 }
  0x6d   : > { %p631_p6 = scmp.lt.s32.totalorder (%p1299_p11), %s630_s20, 2 }
  0x6e   : > { %v569_v2 = vstv %s568_s13 }
  0x70   : > { %428 = vperm.xlu0 %901, %v420_v6  }
  0x71   : > { %v416_v7 = vld [vmem:[#allocation15] sm:$0xf]  ;;  %494 = vperm.xlu1 %902, %v486_v15  }
  0x72   : > { %437 = vst [vmem:[#allocation1] ss:$4 sm:$0xff] %v416_v7  ;;  %547 = vperm.xlu2 %903, %v539_v16  }
  0x79   : > { %v438_v8 = vld.sshfl [vmem:[#allocation1] sm:$0xff pattern:$0x73625140]  ;;  %v439_v9 = vld.sshfl [vmem:[#allocation1 + $0x8] sm:$0xff pattern:$0x73625140] }
  0x7a   : > { %v445_v10 = vsel %vm444_vm0, %v438_v8, 0  ;;  %v447_v11 = vsel %vm444_vm0, %v439_v9, 0 }
  0x7b   : > { %456 = vmatpush.bf16.msra.mxu0 %v445_v10  ;;  %470 = vmatpush.bf16.msra.mxu1 %v447_v11 }
  0x7e   : > { %788 = vmatmul.msk.bf16.vlgmr.msra.gmra.mxu0 %vm440_vm1, %v804_v12  ;;  %789 = vmatmul.msk.bf16.vlgmr.msra.gmra.mxu1 %vm440_vm1, %v804_v12 }
  0xc4   : > { %v543_v37 = vpop.permute.xlu2 %542 }
  0xcc   : > { %v548_v49 = vpop.permute.xlu2 %547 }
  0xda   : > { %v424_v17 = vpop.permute.xlu0 %423 }
  0xdb   : > { %v490_v34 = vpop.permute.xlu1 %489 }
  0xe2   : > { %v429_v20 = vpop.permute.xlu0 %428 }
  0xe3   : > { %v495_v40 = vpop.permute.xlu1 %494 }
  0xfb   : > { %v458_v18 = vpop.f32.mrf.mxu0  ;;  %v472_v19 = vpop.f32.mrf.mxu1 }
  0xfc   : > { %v459_v21 = vadd.f32 %v458_v18, %v424_v17  ;;  %v473_v22 = vadd.f32 %v472_v19, %v424_v17 }
  0xfe   : > { %v477_v27 = vmax.f32 %v459_v21, 0.0  ;;  %v478_v28 = vmax.f32 %v473_v22, 0.0 }
 0x103   : > { %v460_v23 = vpop.f32.mrf.mxu0  ;;  %v474_v24 = vpop.f32.mrf.mxu1 }
 0x104   : > { %v461_v25 = vadd.f32 %v460_v23, %v429_v20  ;;  %v475_v26 = vadd.f32 %v474_v24, %v429_v20 }
 0x106   : > { %v479_v29 = vmax.f32 %v461_v25, 0.0  ;;  %v480_v30 = vmax.f32 %v475_v26, 0.0 }
 0x108   : > { %v483_v31 = vpack.c.bf16 %v479_v29, %v477_v27  ;;  %v484_v32 = vpack.c.bf16 %v480_v30, %v478_v28  ;;  %v616_v28 = vlaneseq }
 0x10a   : > { %513 = vmatpush.bf16.msra.mxu2 %v483_v31  ;;  %527 = vmatpush.bf16.msra.mxu3 %v484_v32  ;;  %vm618_vm12 = vcmp.lt.s32.totalorder %v616_v28, 256 }
 0x10d   : > { %794 = vmatmul.msk.bf16.vlgmr.msra.gmra.mxu2 %vm502_vm2, %v805_v33  ;;  %795 = vmatmul.msk.bf16.vlgmr.msra.gmra.mxu3 %vm502_vm2, %v805_v33 }
 0x190   : > { %v515_v35 = vpop.f32.mrf.mxu2  ;;  %v529_v36 = vpop.f32.mrf.mxu3 }
 0x191   : > { %v516_v38 = vadd.f32 %v515_v35, %v490_v34  ;;  %v530_v39 = vadd.f32 %v529_v36, %v490_v34 }
 0x193   : > { %v534_v43 = vmax.f32 %v516_v38, 0.0  ;;  %v535_v44 = vmax.f32 %v530_v39, 0.0 }
 0x195   : > { %v550_v50 = vmul.f32 %v543_v37, %v534_v43  ;;  %v551_v51 = vmul.f32 %v543_v37, %v535_v44 }
 0x198   : > { %v517_v41 = vpop.f32.mrf.mxu2  ;;  %v531_v42 = vpop.f32.mrf.mxu3 }
 0x199   : > { %v518_v45 = vadd.f32 %v517_v41, %v495_v40  ;;  %v532_v46 = vadd.f32 %v531_v42, %v495_v40 }
 0x19b   : > { %v536_v47 = vmax.f32 %v518_v45, 0.0  ;;  %v537_v48 = vmax.f32 %v532_v46, 0.0 }
 0x19d   : > { %v552_v52 = vmul.f32 %v548_v49, %v536_v47  ;;  %v553_v53 = vmul.f32 %v548_v49, %v537_v48 }
 0x19f   : > { %v554_v54 = vadd.f32 %v552_v52, %v550_v50  ;;  %v561_v55 = vadd.f32 %v553_v53, %v551_v51 }
 0x1a1   : > { %v555_v56 = vrot.slane %v554_v54, 4  ;;  %v562_v57 = vrot.slane %v561_v55, 4 }
 0x1a3   : > { %v556_v58 = vadd.f32 %v555_v56, %v554_v54  ;;  %v563_v59 = vadd.f32 %v562_v57, %v561_v55 }
 0x1a5   : > { %v557_v60 = vrot.slane %v556_v58, 2  ;;  %v564_v61 = vrot.slane %v563_v59, 2 }
 0x1a7   : > { %v558_v62 = vadd.f32 %v557_v60, %v556_v58  ;;  %v565_v63 = vadd.f32 %v564_v61, %v563_v59 }
 0x1a9   : > { %v559_v0 = vrot.slane %v558_v62, 1  ;;  %v566_v1 = vrot.slane %v565_v63, 1 }
 0x1ab   : > { %v560_v3 = vadd.f32 %v559_v0, %v558_v62  ;;  %v567_v4 = vadd.f32 %v566_v1, %v565_v63 }
 0x1ad   : > { %v570_v5 = vadd.f32 %v569_v2, %v560_v3  ;;  %v571_v6 = vadd.f32 %v569_v2, %v567_v4 }
 0x1af   : > { %v796_v7 = vmul.f32 -1.442695, %v570_v5  ;;  %v797_v8 = vmul.f32 -1.442695, %v571_v6 }
 0x1b1   : > { %904 = vpow2.f32 %v796_v7 }
 0x1b2   : > { %906 = vpow2.f32 %v797_v8 }
 0x1b7   : > { %v905_v9 = vpop.eup %904 }
 0x1b8   : > { %v907_v10 = vpop.eup %906  ;;  %v578_v11 = vadd.f32 1.0, %v905_v9 }
 0x1b9   : > { %v579_v12 = vadd.f32 1.0, %v907_v10 }
 0x1ba   : > { %908 = vrcp.f32 %v578_v11  ;;  %vm585_vm5 = vweird.f32 %v578_v11  ;;  %v591_v24 = vand.u32 2147483648, %v578_v11  ;;  %v589_v26 = vand.u32 2147483647, %v578_v11 }
 0x1bb   : > { %910 = vrcp.f32 %v579_v12  ;;  %v606_v20 = vand.u32 2147483648, %v579_v12  ;;  %v604_v22 = vand.u32 2147483647, %v579_v12  ;;  %vm600_vm7 = vweird.f32 %v579_v12 }
 0x1bc   : > { %v592_v32 = vor.u32 1.1754944e-38, %v591_v24  ;;  %vm590_vm11 = vcmp.eq.f32.partialorder %v589_v26, 8.507059e+37 }
 0x1bd   : > { %v607_v29 = vor.u32 1.1754944e-38, %v606_v20  ;;  %vm605_vm9 = vcmp.eq.f32.partialorder %v604_v22, 8.507059e+37 }
 0x1c0   : > { %v909_v13 = vpop.eup %908 }
 0x1c1   : > { %v911_v14 = vpop.eup %910  ;;  %v581_v15 = vmul.f32 %v909_v13, %v578_v11  ;;  %vm586_vm3 = vweird.f32 %v909_v13 }
 0x1c2   : > { %v596_v16 = vmul.f32 %v911_v14, %v579_v12  ;;  %vm601_vm4 = vweird.f32 %v911_v14  ;;  %vm1409_vm6 = vmor %vm585_vm5, %vm586_vm3 }
 0x1c3   : > { %v582_v17 = vsub.f32 1.0, %v581_v15  ;;  %vm602_vm8 = vmor %vm600_vm7, %vm601_vm4 }
 0x1c4   : > { %v597_v18 = vsub.f32 1.0, %v596_v16 }
 0x1c5   : > { %v583_v19 = vmul.f32 %v909_v13, %v582_v17 }
 0x1c6   : > { %v598_v21 = vmul.f32 %v911_v14, %v597_v18 }
 0x1c7   : > { %v584_v23 = vadd.f32 %v909_v13, %v583_v19 }
 0x1c8   : > { %v599_v27 = vadd.f32 %v911_v14, %v598_v21 }
 0x1c9   : > { %v588_v30 = vsel %vm1409_vm6, %v909_v13, %v584_v23 }
 0x1ca   : > { %v603_v31 = vsel %vm602_vm8, %v911_v14, %v599_v27  ;;  %v593_v35 = vsel %vm590_vm11, %v592_v32, %v588_v30 }
 0x1cb   : > { %v608_v33 = vsel %vm605_vm9, %v607_v29, %v603_v31  ;;  %628 = sbr.rel (!%p1299_p11) target bundleno = 493 (0x1ed), region = 76 }
 0x1cc   : > { %v612_v34 = vrot.slane %v608_v33, 7 }
 0x1ce   : > { %v614_v36 = vsel %vm613_vm10, %v593_v35, %v612_v34 }
 0x1cf   : > { %620 = vst.msk [vmem:[%s387_s18] sm:$0x3] %vm618_vm12, %v614_v36 }
 0x1d0   : > { %s1515_s20 = smov (!%p631_p6, %s630_s20), 2 }
 0x1d1   : > { %s633_s0 = ssub.s32 2, %s1515_s20 }
 0x1d2   : > { %s634_s25 = sshll.u32 %s633_s0, 4 }
 0x1d3   : > { %635 = vsyncadd %s622_s23, %s634_s25  ;;  %p800_p10 = scmp.ne.s32.totalorder %s1515_s20, 0  ;;  %s637_s2 = scalar_lea.hbm %s1477_s7, %s799_s12 }
 0x1d4   : > { %s638_s11 = sshll.u32 %s1515_s20, 4  ;;  %s639_s5 = sshll.u32 %s387_s18, 4  ;;  %s1430_s5 = int_to_ptr.vmem [resolvable:$true] %s639_s5 }
 0x1d5   : > { %s641_s19 = sshll.u32 %s637_s2, 4  ;;  %s1101_s24 = sshra.s32 %s1430_s5, 4  ;;  %s642_s19 = int_to_ptr.hbm [resolvable:$true] %s641_s19  ;;  %s1102_s24 = int_to_ptr.vmem [resolvable:$true] %s1101_s24 }
 0x1d6   : > { %s1103_s21 = sshrl.u32 %s638_s11, 4  ;;  %s1203_s17 = smov [#allocation14]  }
 0x1d7   : > { %s1108_s10 = scalar_lea.vmem %s1102_s24, %s1103_s21  ;;  %s1112_s1 = scalar_lea.vmem %s1203_s17, 4 }
 0x1d8   : > { %p1109_p11 = scmp.ne.s32.totalorder %s1102_s24, %s1108_s10  ;;  %p1114_p3 = scmp.lt.s32.totalorder %s1112_s1, %s1108_s10 }
 0x1da   : > { %p1110_p1 = pnand %p1109_p11, %p800_p10 }
 0x1dc   : > { %p1111_p0 = pneg %p1110_p1 }
 0x1de   : > { %p1116_p7 = pnand %p1114_p3, %p1111_p0 }
 0x1e0   : > { %1119 = shalt.err (!%p1116_p7)
}
 0x1e1   : > { %s1120_s8 = sshra.s32 %s642_s19, 4  ;;  %s1131_s18 = scalar_lea.hbm %s1477_s7, 3  ;;  %s1121_s8 = int_to_ptr.hbm [resolvable:$true] %s1120_s8 }
 0x1e2   : > { %s1127_s9 = scalar_lea.hbm %s1121_s8, %s1103_s21  ;;  %p1132_p13 = scmp.lt.s32.totalorder %s1121_s8, %s1477_s7 }
 0x1e3   : > { %p1128_p8 = scmp.ne.s32.totalorder %s1121_s8, %s1127_s9  ;;  %p1133_p2 = scmp.lt.s32.totalorder %s1131_s18, %s1127_s9 }
 0x1e5   : > { %p1129_p4 = pnand %p1128_p8, %p800_p10  ;;  %p1134_p5 = por %p1133_p2, %p1132_p13 }
 0x1e7   : > { %p1130_p12 = pneg %p1129_p4 }
 0x1e9   : > { %p1135_p9 = pnand %p1134_p5, %p1130_p12 }
 0x1eb   : > { %1138 = shalt.err (!%p1135_p9)
}
 0x1ec   : > { %644 = dma.vmem_to_hbm [thread:$0]  (%p800_p10), %s1430_s5, %s638_s11, %s642_s19, %s622_s23  }
 0x1ed PF: > { %s653_s25 = sand.u32 1, %s1178_s26   ;;  %p1505_p6 = scmp.ne.s32.totalorder %s1490_s15, 0 }
 0x1ee   : > { %p1506_p11 = scmp.ge.s32.totalorder %s1190_s29, 2  ;;  %s654_s22 = scalar_lea.sflag [#allocation5], %s653_s25 }
 0x1f0   : > { %p845_p1 = pnand %p1506_p11, %p1505_p6 }
 0x1f2   : > { %p846_p0 = pneg %p845_p1 }
 0x1f4   : > { %1173 = dma.done.wait (%p846_p0), %s654_s22, 32  }
 0x1f5   : > { %1175 = vsyncadd (%p846_p0), %s654_s22, 4294967264  ;;  %s1507_s29 = sld [smem:[#allocation21_spill]]  ;;  %s1509_s26 = smov %s1182_s27 }
 0x1f6   : > { %s1508_s30 = sld [smem:[#allocation22_spill]]  ;;  %s1510_s27 = smov %s1186_s28 }
 0x1fb   : > { %p24_p3 = scmp.ge.s32.totalorder %s1507_s29, 4  }
 0x1fc   : > { %s1511_s28 = smov %s1508_s30 }
 0x1fd   :  { %26 = sbr.rel (!%p24_p3) target bundleno = 13 (0xd), region = 115 }
 0x202   :  { %660 = vsyncpa [#allocation4], 1 }
 0x203   :  { %662 = vsyncpa [#allocation4 + $0x1], 1 }
 0x204   :  { %663 = vsyncpa [#allocation7], 1 }
 0x205   :  { %664 = vsyncpa [#allocation10], 1 }
 0x206   :  { %665 = vsyncpa [#allocation13], 1 }
 0x207   :  { %666 = vsyncpa [#allocation5], 1 }
 0x208   :  { %668 = vsyncpa [#allocation5 + $0x1], 1 }

</bundles_post_ra>
